<compile_context>
chip_gen: v7x
topology: tpu7x:2x2x1
jax: 0.10.0
libtpu: 0.0.40
codegen_flags: <defaults>
</compile_context>

<pallas_src>
import functools

import jax
import jax.numpy as jnp
from jax.experimental import pallas as pl
from jax.experimental.pallas import tpu as pltpu


def _focal_loss_kernel(x_ref, t_ref, a_ref, out_ref, *, gamma, n_valid, tile_n):
    # x_ref: (C, T) logits tile (lane-dense over samples)
    # t_ref: (1, T) int32 target class ids
    # a_ref: (C, 1) float32 per-class alpha
    x = x_ref[...].astype(jnp.float32)
    t = t_ref[...]
    a = a_ref[...].astype(jnp.float32)

    # One-hot of the target along the class (sublane) axis.
    row_ids = jax.lax.broadcasted_iota(jnp.int32, x.shape, dimension=0)   # (C, T)
    mask = (row_ids == t).astype(jnp.float32)                             # (C, T)

    # log-sum-exp over the class axis (C is tiny -> a few sublane-wise VPU ops).
    m = jnp.max(x, axis=0, keepdims=True)                                 # (1, T)
    lse = m + jnp.log(jnp.sum(jnp.exp(x - m), axis=0, keepdims=True))     # (1, T)
    x_t = jnp.sum(x * mask, axis=0, keepdims=True)                        # (1, T)
    log_p = x_t - lse                                                     # (1, T)
    p_t = jnp.exp(log_p)                                                  # (1, T)

    alpha_t = jnp.sum(a * mask, axis=0, keepdims=True)                    # (1, T)

    # (1 - p)^gamma : integer gamma -> repeated multiplication (VALU, ~free);
    # non-integer gamma -> EUP exp/log1p fallback.
    q = 1.0 - p_t
    g_int = int(gamma)
    if float(gamma) == float(g_int) and g_int >= 0:
        modulator = jnp.ones_like(q)
        for _ in range(g_int):
            modulator = modulator * q
    else:
        modulator = jnp.exp(gamma * jnp.log1p(-p_t))

    loss = -alpha_t * modulator * log_p                                   # (1, T)

    # Zero out padded samples (columns beyond the real batch size).
    col = (pl.program_id(0) * tile_n
           + jax.lax.broadcasted_iota(jnp.int32, loss.shape, dimension=1))
    loss = jnp.where(col < n_valid, loss, 0.0)

    # Per-tile partial sum.
    out_ref[...] = jnp.sum(loss).reshape(1, 1, 1)


def focal_loss(inputs, targets, alpha=None, gamma=2.0, class_num=5,
               size_average=False, tile_n=2048):
    """inputs: (N, C) float logits, targets: (N,) int class ids."""
    n, c = inputs.shape
    assert c == class_num

    if alpha is None:
        alpha_col = jnp.ones((class_num, 1), dtype=jnp.float32)   # torch.ones(C, 1)
    else:
        alpha_col = jnp.asarray(alpha, jnp.float32).reshape(class_num, 1)

    # Tile size: multiple of 128 lanes, capped at tile_n; pad N up to a multiple.
    tn = min(int(tile_n), max(128, ((n + 127) // 128) * 128))
    n_pad = ((n + tn - 1) // tn) * tn
    num_tiles = n_pad // tn

    # (N, C) -> (C, N_pad): samples on the lane axis. Keep native dtype (bf16 ok).
    x_t = jnp.transpose(inputs)
    t_row = jnp.asarray(targets, jnp.int32).reshape(1, n)
    if n_pad != n:
        x_t = jnp.pad(x_t, ((0, 0), (0, n_pad - n)))
        t_row = jnp.pad(t_row, ((0, 0), (0, n_pad - n)))

    kernel = functools.partial(
        _focal_loss_kernel, gamma=float(gamma), n_valid=n, tile_n=tn)

    itemsize = jnp.dtype(inputs.dtype).itemsize
    cost = pl.CostEstimate(
        flops=int(n_pad * (6 * c + 12)),
        transcendentals=int(n_pad * (c + 2)),
        bytes_accessed=int(n_pad * c * itemsize + n_pad * 4 + c * 4 + num_tiles * 4),
    )

    partials = pl.pallas_call(
        kernel,
        out_shape=jax.ShapeDtypeStruct((num_tiles, 1, 1), jnp.float32),
        grid=(num_tiles,),
        in_specs=[
            pl.BlockSpec((c, tn), lambda i: (0, i)),   # logits stream
            pl.BlockSpec((1, tn), lambda i: (0, i)),   # targets stream
            pl.BlockSpec((c, 1), lambda i: (0, 0)),    # alpha, resident
        ],
        out_specs=pl.BlockSpec((1, 1, 1), lambda i: (i, 0, 0)),
        compiler_params=pltpu.CompilerParams(
            dimension_semantics=("parallel",),       # shard tiles across TCs (v7x)
            vmem_limit_bytes=16 * 1024 * 1024,       # tiny tiles; safe on v5e/v6e/v7x
        ),
        cost_estimate=cost,
    )(x_t, t_row, alpha_col)

    total = jnp.sum(partials)
    if size_average:
        total = total / jnp.float32(n)
    return total


def _focal_loss_ref(inputs, targets, alpha, gamma, size_average):
    p = jax.nn.softmax(inputs.astype(jnp.float32), axis=1)
    mask = jax.nn.one_hot(targets, inputs.shape[1], dtype=jnp.float32)
    probs = jnp.sum(p * mask, axis=1)
    a = alpha.reshape(-1)[targets]
    batch_loss = -a * (1.0 - probs) ** gamma * jnp.log(probs)
    return jnp.mean(batch_loss) if size_average else jnp.sum(batch_loss)


if __name__ == "__main__":
    key = jax.random.PRNGKey(0)
    k1, k2, k3, k4 = jax.random.split(key, 4)

    C = 5  # module default class_num
    alpha = jnp.ones((C, 1), dtype=jnp.float32)   # same as alpha=None path

    # Case 1: small batch, sum reduction (size_average=False)
    N1 = 8
    logits1 = jax.random.normal(k1, (N1, C), dtype=jnp.float32)
    targets1 = jax.random.randint(k2, (N1,), 0, C, dtype=jnp.int32)
    loss1 = focal_loss(logits1, targets1, alpha=alpha, gamma=2.0,
                       class_num=C, size_average=False)
    loss1 = jax.block_until_ready(loss1)
    ref1 = _focal_loss_ref(logits1, targets1, alpha, 2.0, False)
    assert jnp.allclose(loss1, ref1, rtol=1e-5, atol=1e-5), (loss1, ref1)

    # Case 2: batch spanning multiple grid tiles + padding + mean reduction
    N2 = 300
    logits2 = jax.random.normal(k3, (N2, C), dtype=jnp.float32) * 3.0
    targets2 = jax.random.randint(k4, (N2,), 0, C, dtype=jnp.int32)
    loss2 = focal_loss(logits2, targets2, alpha=alpha, gamma=2.0,
                       class_num=C, size_average=True, tile_n=128)
    loss2 = jax.block_until_ready(loss2)
    ref2 = _focal_loss_ref(logits2, targets2, alpha, 2.0, True)
    assert jnp.allclose(loss2, ref2, rtol=1e-5, atol=1e-5), (loss2, ref2)

    print("KERNEL_OK")
</pallas_src>

<mosaic_0001>
module attributes {stable_mosaic.version = 11 : i64} {
  func.func @_focal_loss_kernel(%arg0: i32, %arg1: memref<5x128xf32, #tpu.memory_space<vmem>>, %arg2: memref<1x128xi32, #tpu.memory_space<vmem>>, %arg3: memref<5x1xf32, #tpu.memory_space<vmem>>, %arg4: memref<1x1x1xf32, #tpu.memory_space<vmem>>) attributes {dimension_semantics = [#tpu.dimension_semantics<parallel>], iteration_bounds = array<i64: 1>, scalar_prefetch = 0 : i64, scratch_operands = 0 : i64, tpu.core_type = #tpu.core_type<tc>, window_params = [{transform_indices = @transform_0, window_bounds = array<i64: 5, 128>}, {transform_indices = @transform_1, window_bounds = array<i64: 1, 128>}, {pipeline_mode = #tpu.pipeline_mode<synchronous>, transform_indices = @transform_2, window_bounds = array<i64: 5, 1>}, {transform_indices = @transform_3, window_bounds = array<i64: 1, 1, 1>}]} {
    %c0 = arith.constant 0 : index
    %c0_0 = arith.constant 0 : index
    %0 = vector.load %arg1[%c0, %c0_0] : memref<5x128xf32, #tpu.memory_space<vmem>>, vector<5x128xf32>
    %c0_1 = arith.constant 0 : index
    %c0_2 = arith.constant 0 : index
    %1 = vector.load %arg2[%c0_1, %c0_2] : memref<1x128xi32, #tpu.memory_space<vmem>>, vector<1x128xi32>
    %c0_3 = arith.constant 0 : index
    %c0_4 = arith.constant 0 : index
    %2 = vector.load %arg3[%c0_3, %c0_4] : memref<5x1xf32, #tpu.memory_space<vmem>>, vector<5x1xf32>
    %3 = tpu.iota {dimensions = array<i32: 0>} : vector<5x128xi32>
    %4 = vector.broadcast %1 : vector<1x128xi32> to vector<5x128xi32>
    %5 = arith.cmpi eq, %3, %4 : vector<5x128xi32>
    %6 = arith.extui %5 : vector<5x128xi1> to vector<5x128xi32>
    %7 = arith.sitofp %6 : vector<5x128xi32> to vector<5x128xf32>
    %cst = arith.constant dense<0xFF800000> : vector<128xf32>
    %8 = vector.multi_reduction <maximumf>, %0, %cst [0] : vector<5x128xf32> to vector<128xf32>
    %9 = vector.shape_cast %8 : vector<128xf32> to vector<1x128xf32>
    %10 = vector.broadcast %9 : vector<1x128xf32> to vector<5x128xf32>
    %11 = arith.subf %0, %10 : vector<5x128xf32>
    %12 = math.exp %11 : vector<5x128xf32>
    %cst_5 = arith.constant dense<0.000000e+00> : vector<128xf32>
    %13 = vector.multi_reduction <add>, %12, %cst_5 [0] : vector<5x128xf32> to vector<128xf32>
    %14 = vector.shape_cast %13 : vector<128xf32> to vector<1x128xf32>
    %15 = math.log %14 : vector<1x128xf32>
    %16 = arith.addf %9, %15 : vector<1x128xf32>
    %17 = arith.mulf %0, %7 : vector<5x128xf32>
    %cst_6 = arith.constant dense<0.000000e+00> : vector<128xf32>
    %18 = vector.multi_reduction <add>, %17, %cst_6 [0] : vector<5x128xf32> to vector<128xf32>
    %19 = vector.shape_cast %18 : vector<128xf32> to vector<1x128xf32>
    %20 = arith.subf %19, %16 : vector<1x128xf32>
    %21 = math.exp %20 : vector<1x128xf32>
    %22 = vector.broadcast %2 : vector<5x1xf32> to vector<5x128xf32>
    %23 = arith.mulf %22, %7 : vector<5x128xf32>
    %cst_7 = arith.constant dense<0.000000e+00> : vector<128xf32>
    %24 = vector.multi_reduction <add>, %23, %cst_7 [0] : vector<5x128xf32> to vector<128xf32>
    %25 = vector.shape_cast %24 : vector<128xf32> to vector<1x128xf32>
    %cst_8 = arith.constant 1.000000e+00 : f32
    %26 = vector.broadcast %cst_8 : f32 to vector<1x128xf32>
    %27 = arith.subf %26, %21 : vector<1x128xf32>
    %cst_9 = arith.constant 1.000000e+00 : f32
    %28 = vector.broadcast %cst_9 : f32 to vector<1x128xf32>
    %29 = arith.mulf %28, %27 : vector<1x128xf32>
    %30 = arith.mulf %29, %27 : vector<1x128xf32>
    %cst_10 = arith.constant 0.000000e+00 : f32
    %31 = vector.broadcast %cst_10 : f32 to vector<1x128xf32>
    %32 = arith.subf %31, %25 : vector<1x128xf32>
    %33 = arith.mulf %32, %30 : vector<1x128xf32>
    %34 = arith.mulf %33, %20 : vector<1x128xf32>
    %c128_i32 = arith.constant 128 : i32
    %35 = arith.muli %arg0, %c128_i32 : i32
    %36 = tpu.iota {dimensions = array<i32: 1>} : vector<1x128xi32>
    %37 = vector.broadcast %35 : i32 to vector<1x128xi32>
    %38 = arith.addi %37, %36 : vector<1x128xi32>
    %c8_i32 = arith.constant 8 : i32
    %39 = vector.broadcast %c8_i32 : i32 to vector<1x128xi32>
    %40 = arith.cmpi slt, %38, %39 : vector<1x128xi32>
    %cst_11 = arith.constant 0.000000e+00 : f32
    %41 = vector.broadcast %cst_11 : f32 to vector<1x128xf32>
    %42 = arith.select %40, %34, %41 : vector<1x128xi1>, vector<1x128xf32>
    %43 = vector.shape_cast %42 : vector<1x128xf32> to vector<1x1x128xf32>
    %cst_12 = arith.constant dense<0.000000e+00> : vector<1xf32>
    %44 = vector.multi_reduction <add>, %43, %cst_12 [1, 2] : vector<1x1x128xf32> to vector<1xf32>
    %45 = vector.shape_cast %44 : vector<1xf32> to vector<1x1x1xf32>
    %46 = vector.extract %45[0, 0, 0] : f32 from vector<1x1x1xf32>
    %47 = vector.broadcast %46 : f32 to vector<1x1x1xf32>
    %c0_13 = arith.constant 0 : index
    %c0_14 = arith.constant 0 : index
    %c0_15 = arith.constant 0 : index
    %48 = vector.load %arg4[%c0_13, %c0_14, %c0_15] : memref<1x1x1xf32, #tpu.memory_space<vmem>>, vector<1x1x1xf32>
    tpu.vector_store %arg4[%c0_13, %c0_14, %c0_15], %47 {strides = array<i32>} : memref<1x1x1xf32, #tpu.memory_space<vmem>>, vector<1x1x1xf32>,
    return
  }
  func.func @transform_0(%arg0: i32) -> (i32, i32) {
    %c0_i32 = arith.constant 0 : i32
    %c0_i32_0 = arith.constant 0 : i32
    return %c0_i32, %arg0 : i32, i32
  }
  func.func @transform_1(%arg0: i32) -> (i32, i32) {
    %c0_i32 = arith.constant 0 : i32
    %c0_i32_0 = arith.constant 0 : i32
    return %c0_i32, %arg0 : i32, i32
  }
  func.func @transform_2(%arg0: i32) -> (i32, i32) {
    %c0_i32 = arith.constant 0 : i32
    %c0_i32_0 = arith.constant 0 : i32
    %c0_i32_1 = arith.constant 0 : i32
    return %c0_i32, %c0_i32_0 : i32, i32
  }
  func.func @transform_3(%arg0: i32) -> (i32, i32, i32) {
    %c0_i32 = arith.constant 0 : i32
    %c0_i32_0 = arith.constant 0 : i32
    %c0_i32_1 = arith.constant 0 : i32
    return %arg0, %c0_i32, %c0_i32_0 : i32, i32, i32
  }
}

</mosaic_0001>

<bundles_post_ra>
// kernel: tpu_custom_call.1
= control target key start
LH: loop header
LB: loop body
LE: loop exit
PB: predicated region body
PF: predicated region fallthrough
CT: control target
= control target key end

     0   :  { %v150_v1 = vmov 0   ;;  %s198_s0 = inlined_call_operand.vmem [shape: f32[5,128], index: 0, kind: input, shape index: {}]   ;;  %s199_s1 = inlined_call_operand.vmem [shape: s32[1,128], index: 1, kind: input, shape index: {}]   ;;  %s200_s2 = inlined_call_operand.vmem [shape: f32[5,1], index: 2, kind: input, shape index: {}]   ;;  %s201_s3 = inlined_call_operand.hbm [shape: f32[1,1,1], index: 3, kind: output, shape index: {}]  }
   0x1   :  { %v17_v0 = vld [vmem:[%s200_s2] sm:$0x1f]  ;;  %119 = vset.pattern.permute.xlu0 %v150_v1 }
   0x2   :  { %8 = vsyncpa [#allocation3], 0  ;;  %61 = vperm.xlu0 %119, %v17_v0   ;;  %vm27_vm0 = vcmask 1044480   ;;  %v15_v2 = vld [vmem:[%s198_s0] sm:$0x1f]  ;;  %v18_v14 = vlaneseq  ;;  %v151_v20 = vmov 0.0  }
   0x3   :  { %v28_v3 = vsel %vm27_vm0, %v15_v2, -inf  ;;  %v112_v18 = vld [vmem:[%s199_s1] ss:$0 sm:$0xff]  ;;  %vm84_vm3 = vcmask 1040384   ;;  %s152_s1 = smov [#allocation2]   ;;  %vm96_vm4 = vcmask 0  }
   0x4   :  { %v29_v4 = vrot.slane %v28_v3, 4  ;;  %v19_v16 = vshrl.u32 %v18_v14, 7  ;;  %v79_v50 = vand.u32 127, %v18_v14  ;;  %s104_s16 = sshll.u32 %s152_s1, 4  ;;  %s105_s16 = int_to_ptr.vmem [resolvable:$true] %s104_s16 }
   0x5   :  { %s126_s18 = scalar_lea.vmem %s105_s16, 16  ;;  %s130_s19 = scalar_lea.vmem %s105_s16, 32 }
   0x6   :  { %v30_v5 = vmax.f32 %v28_v3, %v29_v4  ;;  %vm24_vm1 = vcmp.eq.s32.totalorder %v19_v16, %v112_v18  ;;  %vm82_vm2 = vcmp.lt.s32.totalorder %v79_v50, 8  ;;  %p127_p0 = scmp.ne.s32.totalorder %s105_s16, %s126_s18  ;;  %p131_p1 = scmp.lt.s32.totalorder %s105_s16, %s105_s16 }
   0x7   :  { %v113_v21 = vsel %vm24_vm1, 1.0, %v151_v20  ;;  %p132_p2 = scmp.lt.s32.totalorder %s130_s19, %s126_s18 }
   0x8   :  { %v31_v6 = vrot.slane %v30_v5, 2  ;;  %v48_v23 = vmul.f32 %v113_v21, %v15_v2 }
   0x9   :  { %p133_p3 = por %p132_p2, %p131_p1 }
   0xa   :  { %v32_v7 = vmax.f32 %v30_v5, %v31_v6  ;;  %v49_v25 = vsel %vm27_vm0, %v48_v23, 0.0 }
   0xb   :  { %v50_v27 = vrot.slane %v49_v25, 4  ;;  %p134_p4 = pnand %p133_p3, %p127_p0 }
   0xc   :  { %v33_v8 = vrot.slane %v32_v7, 1 }
   0xd   :  { %v51_v28 = vadd.f32 %v50_v27, %v49_v25 }
   0xe   :  { %v34_v9 = vmax.f32 %v32_v7, %v33_v8 }
   0xf   :  { %v52_v29 = vrot.slane %v51_v28, 2 }
  0x10   :  { %v35_v10 = vsub.f32 %v15_v2, %v34_v9 }
  0x11   :  { %v53_v30 = vadd.f32 %v52_v29, %v51_v28 }
  0x12   :  { %v36_v11 = vmul.f32 1.442695, %v35_v10 }
  0x13   :  { %v54_v33 = vrot.slane %v53_v30, 1 }
  0x14   :  { %120 = vpow2.f32 %v36_v11 }
  0x15   :  { %v55_v35 = vadd.f32 %v54_v33, %v53_v30 }
  0x1e   :  { %v121_v12 = vpop.eup %120 }
  0x1f   :  { %v38_v13 = vsel %vm27_vm0, %v121_v12, 0.0 }
  0x20   :  { %v39_v15 = vrot.slane %v38_v13, 4 }
  0x22   :  { %v40_v17 = vadd.f32 %v39_v15, %v38_v13 }
  0x24   :  { %v41_v19 = vrot.slane %v40_v17, 2 }
  0x26   :  { %v42_v22 = vadd.f32 %v41_v19, %v40_v17 }
  0x28   :  { %v43_v24 = vrot.slane %v42_v22, 1 }
  0x2a   :  { %v44_v26 = vadd.f32 %v43_v24, %v42_v22 }
  0x2c   :  { %122 = vlog2.f32 %v44_v26 }
  0x36   :  { %v123_v31 = vpop.eup %122 }
  0x37   :  { %v46_v32 = vmul.f32 0.6931472, %v123_v31 }
  0x39   :  { %v47_v34 = vadd.f32 %v46_v32, %v34_v9 }
  0x3b   :  { %v56_v36 = vsub.f32 %v55_v35, %v47_v34 }
  0x3d   :  { %v57_v37 = vmul.f32 1.442695, %v56_v36 }
  0x3f   :  { %124 = vpow2.f32 %v57_v37 }
  0x49   :  { %v125_v43 = vpop.eup %124 }
  0x4a   :  { %v72_v46 = vsub.f32 1.0, %v125_v43 }
  0x4c   :  { %v73_v49 = vmul.f32 %v72_v46, %v72_v46 }
  0x81   :  { %v62_v38 = vpop.permute.xlu0 %61 }
  0x82   :  { %v64_v39 = vmul.f32 %v113_v21, %v62_v38 }
  0x84   :  { %v65_v40 = vsel %vm27_vm0, %v64_v39, 0.0 }
  0x85   :  { %v66_v41 = vrot.slane %v65_v40, 4 }
  0x87   :  { %v67_v42 = vadd.f32 %v66_v41, %v65_v40 }
  0x89   :  { %v68_v44 = vrot.slane %v67_v42, 2 }
  0x8b   :  { %v69_v45 = vadd.f32 %v68_v44, %v67_v42 }
  0x8d   :  { %v70_v47 = vrot.slane %v69_v45, 1 }
  0x8f   :  { %v71_v48 = vadd.f32 %v70_v47, %v69_v45 }
  0x91   :  { %v74_v51 = vsub.f32 0.0, %v71_v48 }
  0x93   :  { %v75_v52 = vmul.f32 %v74_v51, %v73_v49 }
  0x95   :  { %v76_v53 = vmul.f32 %v75_v52, %v56_v36 }
  0x97   :  { %v83_v54 = vsel %vm82_vm2, %v76_v53, 0.0 }
  0x98   :  { %v85_v55 = vsel %vm84_vm3, %v83_v54, 0.0 }
  0x99   :  { %86 = vadd.xlane.f32.xlu0 %v85_v55 }
 0x126   :  { %v87_v56 = vpop.xlane.xlu0 %86 }
 0x127   :  { %v88_v57 = vrot.slane %v87_v56, 4 }
 0x129   :  { %v89_v58 = vadd.f32 %v88_v57, %v87_v56 }
 0x12b   :  { %v90_v59 = vrot.slane %v89_v58, 2 }
 0x12d   :  { %v91_v60 = vadd.f32 %v90_v59, %v89_v58 }
 0x12f   :  { %v92_v61 = vrot.slane %v91_v60, 1 }
 0x131   :  { %v93_v62 = vadd.f32 %v92_v61, %v91_v60 }
 0x133   :  { %114 = vpush %v93_v62 }
 0x164   :  { %s115_s17 = spop %114 }
 0x165   :  { %v95_v63 = vstv %s115_s17 }
 0x166   :  { %97 = vst.msk [vmem:[#allocation2] sm:$0x1] %vm96_vm4, %v95_v63 }
 0x167   :  { %137 = shalt.err (!%p134_p4)
}
 0x168   :  { %s138_s22 = scalar_lea.hbm %s201_s3, 16 }
 0x169   :  { %p139_p5 = scmp.ne.s32.totalorder %s201_s3, %s138_s22  ;;  %p142_p6 = scmp.lt.u32.totalorder %s138_s22, %s201_s3 }
 0x16b   :  { %p144_p7 = pnand %p142_p6, %p139_p5 }
 0x16d   :  { %147 = shalt.err (!%p144_p7)
}
 0x16e   :  { %107 = dma.vmem_to_hbm [thread:$0]  %s105_s16, 16, %s201_s3, [#allocation3]  }
 0x16f   :  { %148 = dma.done.wait [#allocation3], 16  }
 0x170   :  { %149 = vsyncadd [#allocation3], 4294967280 }
 0x171   :  { %111 = vsyncpa [#allocation3], 1 }

</bundles_post_ra>
